<compile_context>
chip_gen: v5e
topology: v5e:2x2
jax: 0.10.0
libtpu: 0.0.40
codegen_flags: <defaults>
</compile_context>

<pallas_src>
import functools

import jax
import jax.numpy as jnp
import numpy as np
from jax.experimental import pallas as pl
from jax.experimental.pallas import tpu as pltpu


def _round_up(x: int, m: int) -> int:
    return (x + m - 1) // m * m


def _is_v5e() -> bool:
    # v5e has no bf16 EUP -> keep tanh in f32 there; bf16 tanh on v6e/v7x.
    try:
        kind = jax.devices()[0].device_kind.lower()
    except Exception:
        return False
    return ("v5 lite" in kind) or ("v5e" in kind) or ("v5litepod" in kind)


def _head_kernel(x_ref, wp_ref, bp_ref, wc_ref, bc_ref, out_ref, *, bf16_tanh):
    # x_ref: [tb, H] bf16 -- only the CLS rows (see BlockSpec in the wrapper).
    cls = x_ref[...]

    # BertPooler: tanh(cls @ Wp + bp). bf16 MXU operands, f32 accumulate.
    acc = jnp.dot(cls, wp_ref[...], preferred_element_type=jnp.float32) + bp_ref[...]
    if bf16_tanh:
        # v6e/v7x: packed bf16 tanh on the EUP (2x throughput, no extra cast).
        pooled = jnp.tanh(acc.astype(jnp.bfloat16))
    else:
        # v5e: f32 tanh, cast for the second MXU op.
        pooled = jnp.tanh(acc).astype(jnp.bfloat16)

    # Classifier, lane-padded to C_pad (>=128) output columns for dense stores.
    # The padded-column mask is baked into bc_pad (-1e30) so no iota/where here.
    logits = (
        jnp.dot(pooled, wc_ref[...], preferred_element_type=jnp.float32)
        + bc_ref[...]
    )

    # Numerically-stable softmax in f32; exact reciprocal (denom is (tb, 1)).
    m = jnp.max(logits, axis=-1, keepdims=True)
    e = jnp.exp(logits - m)
    denom = jnp.sum(e, axis=-1, keepdims=True)
    out_ref[...] = (e * pl.reciprocal(denom, approx=False)).astype(out_ref.dtype)


def prepare_head_params(wp, bp, wc, bc, *, num_classes):
    """One-time weight prep (hoisted out of the forward path).

    wp: [H, H]  pooler weight (transposed for x @ Wp)
    bp: [H]     pooler bias
    wc: [H, C]  classifier weight (transposed for pooled @ Wc)
    bc: [C]     classifier bias
    """
    H = wp.shape[0]
    C = num_classes
    assert wp.shape == (H, H) and wc.shape == (H, C)
    C_pad = _round_up(max(C, 128), 128)

    wp_bf = wp.astype(jnp.bfloat16)
    wc_pad = jnp.zeros((H, C_pad), jnp.bfloat16).at[:, :C].set(wc.astype(jnp.bfloat16))
    bp_2d = bp.reshape(1, H).astype(jnp.float32)
    # Mask baked into the bias: padded Wc columns are zero, bias -1e30, so
    # exp(logit - max) underflows to exactly 0 in the softmax.
    bc_pad = jnp.full((1, C_pad), -1e30, jnp.float32).at[0, :C].set(
        bc.astype(jnp.float32)
    )
    return dict(wp=wp_bf, bp=bp_2d, wc=wc_pad, bc=bc_pad,
                num_classes=C, c_pad=C_pad, hidden=H)


def pr_model_head(x, params, *, batch_tile=512, out_dtype=jnp.float32):
    """Fused tanh-pooler + linear classifier + softmax head.

    x: [B, S, H] encoder output (only x[:, 0, :] is ever DMA'd; bf16 preferred)
    params: output of prepare_head_params()
    returns: [B, C] class distribution (softmax)
    """
    B, S, H = x.shape
    assert H == params["hidden"] and H % 128 == 0
    C, C_pad = params["num_classes"], params["c_pad"]
    assert batch_tile % 8 == 0

    # --- batch tile / grid selection -------------------------------------
    # >= 2 grid steps when B allows so v7x's two TensorCores both get work
    # (an extra ~0.35us step is noise on single-TC v5e/v6e), and tb sized so
    # batch padding waste is <= 7 rows.
    min_steps = 2 if B >= 16 else 1
    steps = max(pl.cdiv(B, batch_tile), min_steps)
    tb = min(batch_tile, _round_up(pl.cdiv(B, steps), 8))
    B_pad = _round_up(B, tb)
    grid = (B_pad // tb,)

    # --- CLS input in bf16 -------------------------------------------------
    if x.dtype == jnp.bfloat16:
        # Free, contiguous reshape [B,S,H] -> [B,S*H]: columns [0,H) of row b
        # are exactly x[b,0,:].  A (tb,H) block at block index (i,0) DMAs ONLY
        # the CLS rows (tb*H bf16 per step) -- the full activation never moves.
        x2d = x.reshape(B, S * H)
    else:
        # Fallback: cast only the CLS slice (B*H elements), never the full x.
        x2d = x[:, 0, :].astype(jnp.bfloat16)
    if B_pad != B:
        x2d = jnp.pad(x2d, ((0, B_pad - B), (0, 0)))

    kernel = functools.partial(_head_kernel, bf16_tanh=not _is_v5e())

    out_pad = pl.pallas_call(
        kernel,
        out_shape=jax.ShapeDtypeStruct((B_pad, C_pad), out_dtype),
        grid=grid,
        in_specs=[
            # CLS slice of the encoder output only.
            pl.BlockSpec((tb, H), lambda i: (i, 0)),
            # Weights / biases: constant block index -> fetched once, resident
            # across all batch grid steps.
            pl.BlockSpec((H, H), lambda i: (0, 0)),
            pl.BlockSpec((1, H), lambda i: (0, 0)),
            pl.BlockSpec((H, C_pad), lambda i: (0, 0)),
            pl.BlockSpec((1, C_pad), lambda i: (0, 0)),
        ],
        out_specs=pl.BlockSpec((tb, C_pad), lambda i: (i, 0)),
        compiler_params=pltpu.CompilerParams(
            # Batch axis is independent -> megacore sharding (2 TCs on v7x).
            dimension_semantics=("parallel",),
        ),
    )(x2d, params["wp"], params["bp"], params["wc"], params["bc"])

    return out_pad[:B, :C]


if __name__ == "__main__":
    # Small shapes consistent with the module (hidden lane-aligned at 128).
    # B=16 so the batch grid has 2 steps (exercises the megacore-friendly path).
    B, S, H, C = 16, 8, 128, 4

    key = jax.random.PRNGKey(0)
    kx, kwp, kbp, kwc, kbc = jax.random.split(key, 5)

    # TODO(synk): deterministic bf16 stand-in for BERT's last_hidden_state.
    x = jax.random.normal(kx, (B, S, H), jnp.float32).astype(jnp.bfloat16)
    wp = jax.random.normal(kwp, (H, H), jnp.float32) / jnp.sqrt(jnp.float32(H))
    bp = jax.random.normal(kbp, (H,), jnp.float32) * 0.02
    wc = jax.random.normal(kwc, (H, C), jnp.float32) / jnp.sqrt(jnp.float32(H))
    bc = jax.random.normal(kbc, (C,), jnp.float32) * 0.02

    # Weight prep happens ONCE (model init), not per forward call.
    params = prepare_head_params(wp, bp, wc, bc, num_classes=C)

    out = jax.block_until_ready(pr_model_head(x, params))
    assert out.shape == (B, C)

    # Pure-JAX f32 reference of the head (pooler -> classifier -> softmax).
    cls = x[:, 0, :].astype(jnp.float32)
    pooled_ref = jnp.tanh(cls @ wp + bp)
    ref = jax.nn.softmax(pooled_ref @ wc + bc, axis=-1)

    np.testing.assert_allclose(np.asarray(out), np.asarray(ref), atol=2e-2, rtol=2e-2)
    np.testing.assert_allclose(np.asarray(out).sum(axis=-1), np.ones(B), atol=1e-3)

    print("KERNEL_OK")
</pallas_src>

<mosaic_0001>
module attributes {stable_mosaic.version = 11 : i64} {
  func.func @_head_kernel(%arg0: i32, %arg1: memref<8x128xbf16, #tpu.memory_space<vmem>>, %arg2: memref<128x128xbf16, #tpu.memory_space<vmem>>, %arg3: memref<1x128xf32, #tpu.memory_space<vmem>>, %arg4: memref<128x128xbf16, #tpu.memory_space<vmem>>, %arg5: memref<1x128xf32, #tpu.memory_space<vmem>>, %arg6: memref<8x128xf32, #tpu.memory_space<vmem>>) attributes {dimension_semantics = [#tpu.dimension_semantics<parallel>], iteration_bounds = array<i64: 2>, scalar_prefetch = 0 : i64, scratch_operands = 0 : i64, tpu.core_type = #tpu.core_type<tc>, window_params = [{transform_indices = @transform_0, window_bounds = array<i64: 8, 128>}, {pipeline_mode = #tpu.pipeline_mode<synchronous>, transform_indices = @transform_1, window_bounds = array<i64: 128, 128>}, {pipeline_mode = #tpu.pipeline_mode<synchronous>, transform_indices = @transform_2, window_bounds = array<i64: 1, 128>}, {pipeline_mode = #tpu.pipeline_mode<synchronous>, transform_indices = @transform_3, window_bounds = array<i64: 128, 128>}, {pipeline_mode = #tpu.pipeline_mode<synchronous>, transform_indices = @transform_4, window_bounds = array<i64: 1, 128>}, {transform_indices = @transform_5, window_bounds = array<i64: 8, 128>}]} {
    %c0 = arith.constant 0 : index
    %c0_0 = arith.constant 0 : index
    %0 = vector.load %arg1[%c0, %c0_0] : memref<8x128xbf16, #tpu.memory_space<vmem>>, vector<8x128xbf16>
    %c0_1 = arith.constant 0 : index
    %c0_2 = arith.constant 0 : index
    %1 = vector.load %arg2[%c0_1, %c0_2] : memref<128x128xbf16, #tpu.memory_space<vmem>>, vector<128x128xbf16>
    %cst = arith.constant dense<0.000000e+00> : vector<8x128xf32>
    %2 = tpu.matmul %0, %1, %cst {dimension_numbers = #tpu.dot_dimension_numbers<[1], [0], [0], [1], [0, 0, 1, 1], [], []>} : vector<8x128xbf16>, vector<128x128xbf16>, vector<8x128xf32> -> vector<8x128xf32>
    %c0_3 = arith.constant 0 : index
    %c0_4 = arith.constant 0 : index
    %3 = vector.load %arg3[%c0_3, %c0_4] : memref<1x128xf32, #tpu.memory_space<vmem>>, vector<1x128xf32>
    %4 = vector.broadcast %3 : vector<1x128xf32> to vector<8x128xf32>
    %5 = arith.addf %2, %4 : vector<8x128xf32>
    %6 = arith.truncf %5 : vector<8x128xf32> to vector<8x128xbf16>
    %7 = math.tanh %6 : vector<8x128xbf16>
    %c0_5 = arith.constant 0 : index
    %c0_6 = arith.constant 0 : index
    %8 = vector.load %arg4[%c0_5, %c0_6] : memref<128x128xbf16, #tpu.memory_space<vmem>>, vector<128x128xbf16>
    %cst_7 = arith.constant dense<0.000000e+00> : vector<8x128xf32>
    %9 = tpu.matmul %7, %8, %cst_7 {dimension_numbers = #tpu.dot_dimension_numbers<[1], [0], [0], [1], [0, 0, 1, 1], [], []>} : vector<8x128xbf16>, vector<128x128xbf16>, vector<8x128xf32> -> vector<8x128xf32>
    %c0_8 = arith.constant 0 : index
    %c0_9 = arith.constant 0 : index
    %10 = vector.load %arg5[%c0_8, %c0_9] : memref<1x128xf32, #tpu.memory_space<vmem>>, vector<1x128xf32>
    %11 = vector.broadcast %10 : vector<1x128xf32> to vector<8x128xf32>
    %12 = arith.addf %9, %11 : vector<8x128xf32>
    %cst_10 = arith.constant dense<0xFF800000> : vector<8xf32>
    %13 = vector.multi_reduction <maximumf>, %12, %cst_10 [1] : vector<8x128xf32> to vector<8xf32>
    %14 = vector.shape_cast %13 : vector<8xf32> to vector<8x1xf32>
    %15 = vector.broadcast %14 : vector<8x1xf32> to vector<8x128xf32>
    %16 = arith.subf %12, %15 : vector<8x128xf32>
    %17 = math.exp %16 : vector<8x128xf32>
    %cst_11 = arith.constant dense<0.000000e+00> : vector<8xf32>
    %18 = vector.multi_reduction <add>, %17, %cst_11 [1] : vector<8x128xf32> to vector<8xf32>
    %19 = vector.shape_cast %18 : vector<8xf32> to vector<8x1xf32>
    %20 = tpu.reciprocal %19 : vector<8x1xf32> -> vector<8x1xf32>
    %21 = vector.broadcast %20 : vector<8x1xf32> to vector<8x128xf32>
    %22 = arith.mulf %17, %21 : vector<8x128xf32>
    %c0_12 = arith.constant 0 : index
    %c0_13 = arith.constant 0 : index
    %23 = vector.load %arg6[%c0_12, %c0_13] : memref<8x128xf32, #tpu.memory_space<vmem>>, vector<8x128xf32>
    tpu.vector_store %arg6[%c0_12, %c0_13], %22 {strides = array<i32>} : memref<8x128xf32, #tpu.memory_space<vmem>>, vector<8x128xf32>,
    return
  }
  func.func @transform_0(%arg0: i32) -> (i32, i32) {
    %c0_i32 = arith.constant 0 : i32
    %c0_i32_0 = arith.constant 0 : i32
    return %arg0, %c0_i32 : i32, i32
  }
  func.func @transform_1(%arg0: i32) -> (i32, i32) {
    %c0_i32 = arith.constant 0 : i32
    %c0_i32_0 = arith.constant 0 : i32
    %c0_i32_1 = arith.constant 0 : i32
    return %c0_i32, %c0_i32_0 : i32, i32
  }
  func.func @transform_2(%arg0: i32) -> (i32, i32) {
    %c0_i32 = arith.constant 0 : i32
    %c0_i32_0 = arith.constant 0 : i32
    %c0_i32_1 = arith.constant 0 : i32
    return %c0_i32, %c0_i32_0 : i32, i32
  }
  func.func @transform_3(%arg0: i32) -> (i32, i32) {
    %c0_i32 = arith.constant 0 : i32
    %c0_i32_0 = arith.constant 0 : i32
    %c0_i32_1 = arith.constant 0 : i32
    return %c0_i32, %c0_i32_0 : i32, i32
  }
  func.func @transform_4(%arg0: i32) -> (i32, i32) {
    %c0_i32 = arith.constant 0 : i32
    %c0_i32_0 = arith.constant 0 : i32
    %c0_i32_1 = arith.constant 0 : i32
    return %c0_i32, %c0_i32_0 : i32, i32
  }
  func.func @transform_5(%arg0: i32) -> (i32, i32) {
    %c0_i32 = arith.constant 0 : i32
    %c0_i32_0 = arith.constant 0 : i32
    return %arg0, %c0_i32 : i32, i32
  }
}

</mosaic_0001>

<bundles_post_ra>
// kernel: tpu_custom_call.1
= control target key start
LH: loop header
LB: loop body
LE: loop exit
PB: predicated region body
PF: predicated region fallthrough
CT: control target
= control target key end

     0   :  { %10 = vsyncpa [#allocation3], 0  ;;  %s1094_s0 = inlined_call_operand.hbm [shape: bf16[16,1024], index: 0, kind: input, shape index: {}]   ;;  %s1095_s1 = inlined_call_operand.hbm [shape: bf16[128,128], index: 1, kind: input, shape index: {}]   ;;  %s1096_s2 = inlined_call_operand.vmem [shape: f32[1,128], index: 2, kind: input, shape index: {}]   ;;  %s1097_s3 = inlined_call_operand.hbm [shape: bf16[128,128], index: 3, kind: input, shape index: {}]   ;;  %s1098_s4 = inlined_call_operand.vmem [shape: f32[1,128], index: 4, kind: input, shape index: {}]   ;;  %s1099_s5 = inlined_call_operand.hbm [shape: f32[16,128], index: 5, kind: output, shape index: {}]  }
   0x1   :  { %12 = vsyncpa [#allocation3 + $0x1], 0 }
   0x2   :  { %13 = vsyncpa [#allocation6], 0 }
   0x3   :  { %14 = vsyncpa [#allocation4], 0 }
   0x4   :  { %16 = vsyncpa [#allocation4 + $0x1], 0  ;;  %s942_s18 = smov 0   ;;  %s944_s19 = smov 0  }
   0x5   :  { %s946_s20 = smov 0   ;;  %s948_s21 = smov 0  }
   0x6 LB: > { %s174_s24 = sshll.u32 %s1095_s1, 4  ;;  %s966_s25 = sadd.s32 4294967295, %s906_s21   ;;  %s906_s21 = sphi %s948_s21, %s1110_s21   ;;  %s902_s20 = sphi %s946_s20, %s1109_s20   ;;  %s898_s19 = sphi %s944_s19, %s1108_s19   ;;  %s894_s18 = sphi %s942_s18, %s1107_s18   ;;  %s175_s24 = int_to_ptr.hbm [resolvable:$true] %s174_s24 }
   0x7   : > { %p572_p0 = scmp.ge.s32.totalorder %s906_s21, 1  ;;  %p43_p1 = scmp.eq.s32.totalorder %s966_s25, 0 }
   0x8   : > { %p163_p2 = scmp.lt.s32.totalorder %s906_s21, 3  ;;  %s908_s27 = smov [#allocation5]  }
   0x9   : > { %s176_s28 = sshll.u32 %s908_s27, 4  ;;  %s191_s6 = sshll.u32 %s1097_s3, 4  ;;  %s177_s28 = int_to_ptr.vmem [resolvable:$true] %s176_s28  ;;  %s192_s6 = int_to_ptr.hbm [resolvable:$true] %s191_s6 }
   0xa   : > { %p971_p3 = pnand %p572_p0, %p163_p2  ;;  %s909_s7 = smov [#allocation7]  }
   0xb   : > { %s193_s8 = sshll.u32 %s909_s7, 4  ;;  %s910_s9 = smov 64   ;;  %s194_s8 = int_to_ptr.vmem [resolvable:$true] %s193_s8 }
   0xc   : > { %p681_p4 = pneg %p971_p3  ;;  %s911_s10 = smov 4  }
   0xd   : > { %s571_s11 = sadd.s32 4294967294, %s906_s21   ;;  %s985_s12 = sadd.s32 1, %s906_s21  }
   0xe   : > { %p682_p6 = pnand %p681_p4, %p43_p1  ;;  %s26_s13 = ssub.s32 %s906_s21, %s985_s12 }
   0xf   : > { %s29_s14 = sadd.s32 1, %s902_s20  ;;  %p27_p7 = scmp.eq.s32.totalorder %s26_s13, 0 }
  0x10   : > { %684 = dma.hbm_to_vmem [thread:$0]  (!%p682_p6), %s175_s24, 1024, %s177_s28, [#allocation6], %s910_s9, %s910_s9, %s911_s10  }
  0x11   : > { %687 = dma.hbm_to_vmem [thread:$0]  (!%p682_p6), %s192_s6, 1024, %s194_s8, [#allocation6], %s910_s9, %s910_s9, %s911_s10  }
  0x12   : > { %p36_p8 = scmp.ne.s32.totalorder %s902_s20, %s898_s19  ;;  %p37_p9 = scmp.eq.s32.totalorder %s906_s21, 0 }
  0x13   : > { %p42_p10 = scmp.ne.s32.totalorder %s898_s19, %s894_s18  ;;  %p150_p13 = scmp.eq.s32.totalorder %s966_s25, 1 }
  0x14   : > { %s996_s15 = scalar_select %p27_p7, %s902_s20, %s29_s14  }
  0x15   : > { %p998_p11 = por %p37_p9, %p36_p8  ;;  %p1004_p12 = por %p43_p1, %p42_p10 }
  0x16   : > { %p156_p0 = scmp.eq.s32.totalorder %s571_s11, 1  ;;  %p698_p2 = scmp.lt.s32.totalorder %s906_s21, 2 }
  0x17   : > { %s210_s22 = sand.u32 1, %s902_s20   ;;  %p1011_p4 = por %p150_p13, %p36_p8 }
  0x18   : > { %p1015_p6 = por %p156_p0, %p42_p10  ;;  %s576_s27 = sshll.u32 %s210_s22, 2 }
  0x19   : > { %s652_s28 = sshll.u32 %s906_s21, 5  ;;  %s214_s7 = scalar_lea.vmem [#allocation2], %s576_s27 }
  0x1a   : > { %s219_s6 = scalar_lea.hbm %s1094_s0, %s652_s28  ;;  %s223_s8 = sshll.u32 %s214_s7, 4  ;;  %s224_s8 = int_to_ptr.vmem [resolvable:$true] %s223_s8 }
  0x1b   : > { %s221_s9 = sshll.u32 %s219_s6, 4  ;;  %p1025_p7 = pnand %p698_p2, %p998_p11  ;;  %s222_s9 = int_to_ptr.hbm [resolvable:$true] %s221_s9 }
  0x1c   : > { %s211_s11 = scalar_lea.sflag [#allocation3], %s210_s22  ;;  %s806_s13 = sshra.s32 %s222_s9, 4  ;;  %s807_s13 = int_to_ptr.hbm [resolvable:$true] %s806_s13 }
  0x1d   : > { %s808_s14 = scalar_lea.hbm %s807_s13, 4  ;;  %p810_p9 = pneg %p1025_p7 }
  0x1e   : > { %p809_p8 = scmp.ne.s32.totalorder %s807_s13, %s808_s14  ;;  %s813_s29 = scalar_lea.hbm %s1094_s0, 64 }
  0x1f   : > { %p814_p11 = scmp.lt.s32.totalorder %s807_s13, %s1094_s0  ;;  %p815_p0 = scmp.lt.s32.totalorder %s813_s29, %s808_s14 }
  0x20   : > { %p811_p10 = pnand %p810_p9, %p809_p8 }
  0x21   : > { %p816_p2 = por %p815_p0, %p814_p11 }
  0x22   : > { %p812_p13 = pneg %p811_p10 }
  0x24   : > { %p817_p5 = pnand %p816_p2, %p812_p13 }
  0x26   : > { %820 = shalt.err (!%p817_p5)
}
  0x27   : > { %691 = dma.hbm_to_vmem [thread:$0]  (!%p1025_p7), %s222_s9, 64, %s224_s8, %s211_s11  }
  0x28   : > { %232 = sbr.rel (%p971_p3) target bundleno = 614 (0x266), region = 40  ;;  %s1042_s22 = sand.u32 (!%p971_p3), 1, %s898_s19  }
  0x29   : > { %s580_s6 = sshll.u32 (!%p971_p3), %s1042_s22, 2  ;;  %s235_s7 = scalar_lea.sflag (!%p971_p3), [#allocation3], %s1042_s22 }
  0x2a   : > { %s238_s27 = scalar_lea.vmem (!%p971_p3), [#allocation2], %s580_s6 }
  0x2d   : > { %881 = dma.done.wait (%p1004_p12), %s235_s7, 64  }
  0x2e   : > { %883 = vsyncadd (%p1004_p12), %s235_s7, 4294967232 }
  0x2f   : > { %885 = dma.done.wait (%p43_p1), [#allocation6], 2048  }
  0x30   : > { %887 = vsyncadd (%p43_p1), [#allocation6], 4294965248  ;;  %v660_v0 = vld [vmem:[#allocation5 + $0x38] sm:$0xff]  ;;  %v659_v1 = vld [vmem:[#allocation5 + $0x30] sm:$0xff]  ;;  %s583_s10 = sshll.u32 %s1042_s22, 3  ;;  %s649_s11 = sshll.u32 %s966_s25, 3 }
  0x31   : > { %345 = vmatpush.bf16.msra.mxu0 %v660_v0  ;;  %v668_v2 = vld [vmem:[#allocation7 + $0x38] sm:$0xff]  ;;  %v667_v3 = vld [vmem:[#allocation7 + $0x30] sm:$0xff]  ;;  %v658_v4 = vld [vmem:[#allocation5 + $0x28] sm:$0xff]  ;;  %s477_s28 = scalar_lea.hbm %s1099_s5, %s649_s11  ;;  %s275_s29 = scalar_lea.vmem [#allocation8], %s583_s10 }
  0x32   : > { %430 = vmatpush.bf16.msra.mxu1 %v668_v2  ;;  %v666_v5 = vld [vmem:[#allocation7 + $0x28] sm:$0xff]  ;;  %v657_v6 = vld [vmem:[#allocation5 + $0x20] sm:$0xff]  ;;  %v656_v8 = vld [vmem:[#allocation5 + $0x18] sm:$0xff]  ;;  %s479_s30 = sshll.u32 %s275_s29, 4  ;;  %s481_s16 = sshll.u32 %s477_s28, 4  ;;  %s480_s30 = int_to_ptr.vmem [resolvable:$true] %s479_s30  ;;  %s482_s16 = int_to_ptr.hbm [resolvable:$true] %s481_s16 }
  0x33   : > { %v665_v7 = vld [vmem:[#allocation7 + $0x20] sm:$0xff]  ;;  %v655_v9 = vld [vmem:[#allocation5 + $0x10] sm:$0xff]  ;;  %v654_v10 = vld [vmem:[#allocation5 + $0x8] sm:$0xff]  ;;  %s467_s25 = scalar_lea.sflag [#allocation4], %s1042_s22  ;;  %s850_s6 = sshra.s32 %s482_s16, 4  ;;  %s851_s6 = int_to_ptr.hbm [resolvable:$true] %s850_s6 }
  0x34   : > { %v653_v11 = vld [vmem:[#allocation5] sm:$0xff]  ;;  %v276_v12 = vld [vmem:[%s238_s27] sm:$0xf]  ;;  %v663_v14 = vld [vmem:[#allocation7 + $0x10] sm:$0xff]  ;;  %s852_s7 = scalar_lea.hbm %s851_s6, 8  ;;  %s856_s17 = scalar_lea.hbm %s1099_s5, 16 }
  0x35   : > { %346 = vmatpush.bf16.msra.mxu0 %v659_v1  ;;  %v664_v13 = vld [vmem:[#allocation7 + $0x18] sm:$0xff]  ;;  %v662_v15 = vld [vmem:[#allocation7 + $0x8] sm:$0xff]  ;;  %v661_v16 = vld [vmem:[#allocation7] sm:$0xff]  ;;  %p853_p1 = scmp.ne.s32.totalorder %s851_s6, %s852_s7  ;;  %p857_p12 = scmp.lt.s32.totalorder %s851_s6, %s1099_s5 }
  0x36   : > { %431 = vmatpush.bf16.msra.mxu1 %v667_v3  ;;  %v738_v17 = vld [vmem:[%s1096_s2] ss:$0 sm:$0xff]  ;;  %p858_p7 = scmp.lt.s32.totalorder %s856_s17, %s852_s7 }
  0x37   : > { %v739_v25 = vld [vmem:[%s1098_s4] ss:$0 sm:$0xff]  ;;  %p854_p3 = pnand %p853_p1, %p1011_p4 }
  0x38   : > { %p859_p8 = por %p858_p7, %p857_p12 }
  0x39   : > { %347 = vmatpush.bf16.msra.mxu0 %v658_v4  ;;  %p855_p5 = pneg %p854_p3 }
  0x3a   : > { %432 = vmatpush.bf16.msra.mxu1 %v666_v5 }
  0x3b   : > { %p860_p9 = pnand %p859_p8, %p855_p5 }
  0x3d   : > { %348 = vmatpush.bf16.msra.mxu0 %v657_v6 }
  0x3e   : > { %433 = vmatpush.bf16.msra.mxu1 %v665_v7 }
  0x41   : > { %349 = vmatpush.bf16.msra.mxu0 %v656_v8 }
  0x42   : > { %434 = vmatpush.bf16.msra.mxu1 %v664_v13 }
  0x45   : > { %350 = vmatpush.bf16.msra.mxu0 %v655_v9 }
  0x46   : > { %435 = vmatpush.bf16.msra.mxu1 %v663_v14 }
  0x49   : > { %351 = vmatpush.bf16.msra.mxu0 %v654_v10 }
  0x4a   : > { %436 = vmatpush.bf16.msra.mxu1 %v662_v15 }
  0x4d   : > { %352 = vmatpush.bf16.msra.mxu0 %v653_v11 }
  0x4e   : > { %437 = vmatpush.bf16.msra.mxu1 %v661_v16 }
  0x50   : > { %353 = vmatmul.bf16.vlgmr.msra.gmra.mxu0 %v276_v12 }
  0xcd   : > { %v354_v18 = vpop.f32.mrf.mxu0 }
  0xce   : > { %v355_v19 = vadd.f32 %v738_v17, %v354_v18 }
  0xd0   : > { %v358_v20 = vpack.c.bf16 %v355_v19, %v355_v19 }
  0xd2   : > { %v359_v21 = vunpack.c.l.bf16 %v358_v20 }
  0xd4   : > { %740 = vtanh.f32 %v359_v21 }
  0xd5   : > { %v356_v22 = vpop.f32.mrf.mxu0 }
  0xda   : > { %v741_v23 = vpop.eup %740 }
  0xdb   : > { %v361_v24 = vpack.c.bf16 %v741_v23, %v741_v23 }
  0xdd   : > { %438 = vmatmul.bf16.vlgmr.msra.gmra.mxu1 %v361_v24 }
 0x15a   : > { %v439_v26 = vpop.f32.mrf.mxu1 }
 0x15b   : > { %v440_v27 = vadd.f32 %v739_v25, %v439_v26 }
 0x15d   : > { %443 = vmax.xlane.f32.xlu0 %v440_v27 }
 0x162   : > { %v441_v28 = vpop.f32.mrf.mxu1 }
 0x1d0   : > { %v444_v29 = vpop.xlane.xlu0 %443 }
 0x1d1   : > { %v445_v30 = vsub.f32 %v440_v27, %v444_v29 }
 0x1d3   : > { %v446_v31 = vmul.f32 1.442695, %v445_v30 }
 0x1d5   : > { %742 = vpow2.f32 %v446_v31 }
 0x1db   : > { %v743_v32 = vpop.eup %742 }
 0x1dc   : > { %448 = vadd.xlane.f32.xlu0 %v743_v32 }
 0x24f   : > { %v449_v33 = vpop.xlane.xlu0 %448 }
 0x250   : > { %744 = vrcp.f32 %v449_v33  ;;  %v461_v37 = vand.u32 2147483648, %v449_v33  ;;  %v459_v39 = vand.u32 2147483647, %v449_v33  ;;  %vm455_vm1 = vweird.f32 %v449_v33 }
 0x252   : > { %v462_v41 = vor.u32 1.1754944e-38, %v461_v37  ;;  %vm460_vm3 = vcmp.eq.f32.partialorder %v459_v39, 8.507059e+37 }
 0x256   : > { %v745_v34 = vpop.eup %744 }
 0x257   : > { %v451_v35 = vmul.f32 %v745_v34, %v449_v33  ;;  %vm456_vm0 = vweird.f32 %v745_v34 }
 0x258   : > { %vm457_vm2 = vmor %vm455_vm1, %vm456_vm0 }
 0x259   : > { %v452_v36 = vsub.f32 1.0, %v451_v35 }
 0x25b   : > { %v453_v38 = vmul.f32 %v745_v34, %v452_v36 }
 0x25d   : > { %v454_v40 = vadd.f32 %v745_v34, %v453_v38 }
 0x25f   : > { %v458_v42 = vsel %vm457_vm2, %v745_v34, %v454_v40 }
 0x260   : > { %v463_v43 = vsel %vm460_vm3, %v462_v41, %v458_v42 }
 0x261   : > { %v464_v44 = vmul.f32 %v743_v32, %v463_v43 }
 0x263   : > { %465 = vst [vmem:[%s275_s29] sm:$0xff] %v464_v44 }
 0x264   : > { %863 = shalt.err (!%p860_p9)
}
 0x265   : > { %679 = dma.vmem_to_hbm [thread:$0]  (%p1011_p4), %s480_s30, 128, %s482_s16, %s467_s25  }
 0x266 PF: > { %s493_s22 = sand.u32 1, %s894_s18   ;;  %p1106_p10 = scmp.ge.s32.totalorder %s906_s21, 2 }
 0x267   : > { %s494_s10 = scalar_lea.sflag [#allocation4], %s493_s22 }
 0x268   : > { %p693_p13 = pnand %p1106_p10, %p1015_p6 }
 0x26a   : > { %p694_p11 = pneg %p693_p13 }
 0x26c   : > { %889 = dma.done.wait (%p694_p11), %s494_s10, 128  }
 0x26d   : > { %891 = vsyncadd (%p694_p11), %s494_s10, 4294967168  ;;  %p19_p0 = scmp.ge.s32.totalorder %s985_s12, 4   ;;  %s1107_s18 = smov %s898_s19 }
 0x26e   : > { %s1108_s19 = smov %s902_s20  ;;  %s1109_s20 = smov %s996_s15 }
 0x26f   : > { %s1110_s21 = smov %s985_s12  ;;  %21 = sbr.rel (!%p19_p0) target bundleno = 6 (0x6), region = 93 }
 0x274   :  { %500 = vsyncpa [#allocation3], 1 }
 0x275   :  { %502 = vsyncpa [#allocation3 + $0x1], 1 }
 0x276   :  { %503 = vsyncpa [#allocation6], 1 }
 0x277   :  { %504 = vsyncpa [#allocation4], 1 }
 0x278   :  { %506 = vsyncpa [#allocation4 + $0x1], 1 }

</bundles_post_ra>
